<compile_context>
chip_gen: v7x
topology: tpu7x:2x2x1
jax: 0.10.0
libtpu: 0.0.40
codegen_flags: <defaults>
</compile_context>

<pallas_src>
import functools

import jax
import jax.numpy as jnp
from jax.experimental import pallas as pl
from jax.experimental.pallas import tpu as pltpu

_EPS = 1e-5
_COMPUTE_DTYPE = jnp.bfloat16   # MXU inputs / activations; epilogue + accumulation in f32


# --------------------------------------------------------------------------
# Pallas kernels
# --------------------------------------------------------------------------
def _mm_bn_kernel(x_ref, w_ref, s_ref, b_ref, o_ref, acc_ref, *, relu):
    """Tiled matmul + fused BN scale/bias (+ReLU) epilogue."""
    k = pl.program_id(2)

    @pl.when(k == 0)
    def _():
        acc_ref[...] = jnp.zeros_like(acc_ref)

    acc_ref[...] += jnp.dot(x_ref[...], w_ref[...],
                            preferred_element_type=jnp.float32)

    @pl.when(k == pl.num_programs(2) - 1)
    def _():
        y = acc_ref[...] * s_ref[...] + b_ref[...]
        if relu:
            y = jnp.maximum(y, 0.0)
        o_ref[...] = y.astype(o_ref.dtype)


def _mm_bn_res_kernel(x_ref, w_ref, s_ref, b_ref, r_ref, o_ref, acc_ref, *, relu):
    """Tiled matmul + fused BN + residual-add (+ReLU) epilogue."""
    k = pl.program_id(2)

    @pl.when(k == 0)
    def _():
        acc_ref[...] = jnp.zeros_like(acc_ref)

    acc_ref[...] += jnp.dot(x_ref[...], w_ref[...],
                            preferred_element_type=jnp.float32)

    @pl.when(k == pl.num_programs(2) - 1)
    def _():
        y = acc_ref[...] * s_ref[...] + b_ref[...]
        y = y + r_ref[...].astype(jnp.float32)
        if relu:
            y = jnp.maximum(y, 0.0)
        o_ref[...] = y.astype(o_ref.dtype)


def _max9_kernel(*refs):
    """Elementwise max over the 9 shifted views of a 3x3 pooling window."""
    o_ref = refs[-1]
    m = refs[0][...]
    for r in refs[1:-1]:
        m = jnp.maximum(m, r[...])
    o_ref[...] = m


def _avgpool_kernel(x_ref, o_ref):
    """Global (adaptive 1x1) average pool: mean over the spatial axis, f32 accumulate."""
    o_ref[...] = jnp.mean(x_ref[...].astype(jnp.float32), axis=1, keepdims=True)


# --------------------------------------------------------------------------
# Tiling helpers
# --------------------------------------------------------------------------
def _round_up(x, m):
    return (x + m - 1) // m * m


def _pick_row_tile(m, max_tile=512):
    """Largest multiple-of-8 tile <= max_tile that divides the (8-padded) row count."""
    mp = _round_up(m, 8)
    for t in range(min(max_tile, mp), 7, -1):
        if t % 8 == 0 and mp % t == 0:
            return t, mp
    return 8, mp  # unreachable: t = 8 always divides mp


def _pick_col_tile(n):
    """256-wide tiles where possible (v6e/v7x MXU), else 128, else the full (small) dim."""
    if n % 256 == 0:
        return 256
    if n % 128 == 0:
        return 128
    return n


# --------------------------------------------------------------------------
# Pallas wrappers
# --------------------------------------------------------------------------
def matmul_bn_act(x2d, w2d, scale, bias, residual=None, relu=True,
                  out_dtype=_COMPUTE_DTYPE):
    """(M,K) @ (K,Nc) with fused BN / residual / ReLU, fully tiled over (M, N, K)."""
    M, K = x2d.shape
    _, Nc = w2d.shape

    tm, Mp = _pick_row_tile(M)
    tk = _pick_col_tile(K)    # full-dim K block when K is not a multiple of 128
    tn = _pick_col_tile(Nc)

    xp = x2d.astype(_COMPUTE_DTYPE)
    if Mp != M:
        xp = jnp.pad(xp, ((0, Mp - M), (0, 0)))
    wp = w2d.astype(_COMPUTE_DTYPE)

    in_specs = [
        pl.BlockSpec((tm, tk), lambda i, j, k: (i, k)),
        pl.BlockSpec((tk, tn), lambda i, j, k: (k, j)),
        pl.BlockSpec((1, tn), lambda i, j, k: (0, j)),
        pl.BlockSpec((1, tn), lambda i, j, k: (0, j)),
    ]
    args = [xp, wp, scale, bias]

    if residual is not None:
        rp = residual.astype(_COMPUTE_DTYPE)
        if Mp != M:
            rp = jnp.pad(rp, ((0, Mp - M), (0, 0)))
        in_specs.append(pl.BlockSpec((tm, tn), lambda i, j, k: (i, j)))
        args.append(rp)
        kernel = functools.partial(_mm_bn_res_kernel, relu=relu)
    else:
        kernel = functools.partial(_mm_bn_kernel, relu=relu)

    n_res = 1 if residual is not None else 0
    flops = 2 * Mp * K * Nc
    bytes_accessed = 2 * (Mp * K + K * Nc + (1 + n_res) * Mp * Nc) + 8 * Nc

    out = pl.pallas_call(
        kernel,
        out_shape=jax.ShapeDtypeStruct((Mp, Nc), out_dtype),
        grid_spec=pltpu.PrefetchScalarGridSpec(
            num_scalar_prefetch=0,
            grid=(Mp // tm, Nc // tn, K // tk),
            in_specs=in_specs,
            out_specs=pl.BlockSpec((tm, tn), lambda i, j, k: (i, j)),
            scratch_shapes=[pltpu.VMEM((tm, tn), jnp.float32)],
        ),
        compiler_params=pltpu.CompilerParams(
            dimension_semantics=("parallel", "parallel", "arbitrary"),
            vmem_limit_bytes=48 * 1024 * 1024,
        ),
        cost_estimate=pl.CostEstimate(flops=flops, transcendentals=0,
                                      bytes_accessed=bytes_accessed),
    )(*args)
    if Mp != M:
        out = out[:M]
    return out


def conv_bn(x, p, relu, residual=None):
    """Conv2d (im2col) + BN (+ residual + ReLU).  x is NHWC (bfloat16)."""
    N, H, W, C = x.shape
    kh, kw, s, pad = p["kh"], p["kw"], p["stride"], p["pad"]
    OH = (H + 2 * pad - kh) // s + 1
    OW = (W + 2 * pad - kw) // s + 1

    if kh == 1 and kw == 1 and pad == 0:
        cols = x[:, ::s, ::s, :].reshape(N * OH * OW, C)
    else:
        # TODO(synk): 3x3 im2col still materializes the (M, kh*kw*C) matrix in HBM
        # (in bf16); a direct-conv kernel with in-kernel window DMAs would avoid it.
        xp = jnp.pad(x, ((0, 0), (pad, pad), (pad, pad), (0, 0)))
        parts = [xp[:, i:i + s * OH:s, j:j + s * OW:s, :]
                 for i in range(kh) for j in range(kw)]
        cols = jnp.concatenate(parts, axis=-1).reshape(N * OH * OW, kh * kw * C)

    res2d = None if residual is None else residual.reshape(N * OH * OW, -1)
    out2d = matmul_bn_act(cols, p["w"], p["scale"], p["bias"],
                          residual=res2d, relu=relu)
    return out2d.reshape(N, OH, OW, -1)


def maxpool_3x3_s2_p1(x):
    """MaxPool2d(kernel_size=3, stride=2, padding=1), row-tiled 9-way max kernel."""
    N, H, W, C = x.shape
    s, pad, k = 2, 1, 3
    OH = (H + 2 * pad - k) // s + 1
    OW = (W + 2 * pad - k) // s + 1
    xp = jnp.pad(x, ((0, 0), (pad, pad), (pad, pad), (0, 0)),
                 constant_values=-jnp.inf)
    M = N * OH * OW
    taps = [xp[:, i:i + s * OH:s, j:j + s * OW:s, :].reshape(M, C)
            for i in range(k) for j in range(k)]

    tm, Mp = _pick_row_tile(M)
    if Mp != M:
        taps = [jnp.pad(t, ((0, Mp - M), (0, 0))) for t in taps]

    out = pl.pallas_call(
        _max9_kernel,
        out_shape=jax.ShapeDtypeStruct((Mp, C), x.dtype),
        grid_spec=pltpu.PrefetchScalarGridSpec(
            num_scalar_prefetch=0,
            grid=(Mp // tm,),
            in_specs=[pl.BlockSpec((tm, C), lambda i: (i, 0))] * 9,
            out_specs=pl.BlockSpec((tm, C), lambda i: (i, 0)),
        ),
        compiler_params=pltpu.CompilerParams(
            dimension_semantics=("parallel",)),
    )(*taps)
    if Mp != M:
        out = out[:M]
    return out.reshape(N, OH, OW, C)


def global_avgpool(x):
    """AdaptiveAvgPool2d((1,1)) + flatten: NHWC -> (N, C), tiled per image."""
    N, H, W, C = x.shape
    HW = H * W
    xr = x.reshape(N, HW, C)
    out = pl.pallas_call(
        _avgpool_kernel,
        out_shape=jax.ShapeDtypeStruct((N, 1, C), jnp.float32),
        grid_spec=pltpu.PrefetchScalarGridSpec(
            num_scalar_prefetch=0,
            grid=(N,),
            in_specs=[pl.BlockSpec((1, HW, C), lambda n: (n, 0, 0))],
            out_specs=pl.BlockSpec((1, 1, C), lambda n: (n, 0, 0)),
        ),
        compiler_params=pltpu.CompilerParams(
            dimension_semantics=("parallel",)),
    )(xr)
    return out.reshape(N, C)


# --------------------------------------------------------------------------
# Deterministic synthetic ResNet-50 parameters
# --------------------------------------------------------------------------
def _conv_bn_params(key, kh, kw, cin, cout, stride, pad):
    kw_, kg, kb, km = jax.random.split(key, 4)
    w = jax.random.normal(kw_, (kh, kw, cin, cout), jnp.float32) * jnp.sqrt(
        2.0 / (kh * kw * cin))
    gamma = 1.0 + 0.1 * jax.random.normal(kg, (cout,), jnp.float32)
    beta = 0.05 * jax.random.normal(kb, (cout,), jnp.float32)
    r_mean = 0.05 * jax.random.normal(km, (cout,), jnp.float32)
    r_var = jnp.ones((cout,), jnp.float32)
    # eval-mode BatchNorm folded to scale/bias
    scale = gamma / jnp.sqrt(r_var + _EPS)
    bias = beta - r_mean * scale
    return dict(w=w.reshape(kh * kw * cin, cout).astype(_COMPUTE_DTYPE),
                scale=scale.reshape(1, cout),
                bias=bias.reshape(1, cout),
                kh=kh, kw=kw, stride=stride, pad=pad)


def init_resnet50_params(key):
    keys = iter(jax.random.split(key, 256))
    params = {"conv1": _conv_bn_params(next(keys), 7, 7, 3, 64, 2, 3)}
    cin = 64
    layers = []
    for planes, blocks, stride in [(64, 3, 1), (128, 4, 2), (256, 6, 2), (512, 3, 2)]:
        layer = []
        for b in range(blocks):
            s = stride if b == 0 else 1
            blk = {
                "c1": _conv_bn_params(next(keys), 1, 1, cin, planes, 1, 0),
                "c2": _conv_bn_params(next(keys), 3, 3, planes, planes, s, 1),
                "c3": _conv_bn_params(next(keys), 1, 1, planes, planes * 4, 1, 0),
            }
            if s != 1 or cin != planes * 4:
                blk["down"] = _conv_bn_params(next(keys), 1, 1, cin, planes * 4, s, 0)
            layer.append(blk)
            cin = planes * 4
        layers.append(layer)
    params["layers"] = layers
    return params


# --------------------------------------------------------------------------
# Forward pass  (== modified_pretrained(images).reshape(N, -1))
# --------------------------------------------------------------------------
def feature_extraction_resnet50(params, images_nchw):
    # TODO(synk): BatchNorm uses eval-mode (running-stat) semantics only;
    #             batch-statistic (train-mode) BN is not reproduced.
    x = jnp.transpose(images_nchw, (0, 2, 3, 1)).astype(_COMPUTE_DTYPE)  # NCHW -> NHWC
    x = conv_bn(x, params["conv1"], relu=True)
    x = maxpool_3x3_s2_p1(x)
    for layer in params["layers"]:
        for blk in layer:
            identity = x
            out = conv_bn(x, blk["c1"], relu=True)
            out = conv_bn(out, blk["c2"], relu=True)
            if "down" in blk:
                identity = conv_bn(x, blk["down"], relu=False)
            # conv3 + BN + residual add + ReLU, fused in one Pallas kernel
            x = conv_bn(out, blk["c3"], relu=True, residual=identity)
    feats = global_avgpool(x)  # (N, 2048) f32 — already flat, matches .reshape(N, -1)
    return feats


if __name__ == "__main__":
    key = jax.random.PRNGKey(0)
    params = init_resnet50_params(key)
    # Small input consistent with ResNet-50's expected layout: NCHW, 3 channels.
    x = jax.random.normal(jax.random.fold_in(key, 1234), (2, 3, 16, 16), jnp.float32)
    feats = feature_extraction_resnet50(params, x)
    feats = jax.block_until_ready(feats)
    assert feats.shape == (2, 2048), feats.shape
    assert bool(jnp.all(jnp.isfinite(feats)))
    print("KERNEL_OK")
</pallas_src>

<mosaic_0001>
module attributes {stable_mosaic.version = 11 : i64} {
  func.func @_mm_bn_kernel(%arg0: i32, %arg1: i32, %arg2: i32, %arg3: memref<128x147xbf16, #tpu.memory_space<vmem>>, %arg4: memref<147x64xbf16, #tpu.memory_space<vmem>>, %arg5: memref<1x64xf32, #tpu.memory_space<vmem>>, %arg6: memref<1x64xf32, #tpu.memory_space<vmem>>, %arg7: memref<128x64xbf16, #tpu.memory_space<vmem>>, %arg8: memref<128x64xf32, #tpu.memory_space<vmem>>) attributes {dimension_semantics = [#tpu.dimension_semantics<parallel>, #tpu.dimension_semantics<parallel>, #tpu.dimension_semantics<arbitrary>], iteration_bounds = array<i64: 1, 1, 1>, scalar_prefetch = 0 : i64, scratch_operands = 1 : i64, tpu.core_type = #tpu.core_type<tc>, window_params = [{transform_indices = @transform_0, window_bounds = array<i64: 128, 147>}, {transform_indices = @transform_1, window_bounds = array<i64: 147, 64>}, {transform_indices = @transform_2, window_bounds = array<i64: 1, 64>}, {transform_indices = @transform_3, window_bounds = array<i64: 1, 64>}, {transform_indices = @transform_4, window_bounds = array<i64: 128, 64>}]} {
    %c0_i32 = arith.constant 0 : i32
    %0 = arith.cmpi eq, %arg2, %c0_i32 : i32
    %1 = arith.extui %0 : i1 to i32
    %c0_i32_0 = arith.constant 0 : i32
    %2 = arith.cmpi ne, %1, %c0_i32_0 : i32
    scf.if %2 {
      %cst_10 = arith.constant 0.000000e+00 : f32
      %12 = vector.broadcast %cst_10 : f32 to vector<128x64xf32>
      %c0_11 = arith.constant 0 : index
      %c0_12 = arith.constant 0 : index
      %13 = vector.load %arg8[%c0_11, %c0_12] : memref<128x64xf32, #tpu.memory_space<vmem>>, vector<128x64xf32>
      tpu.vector_store %arg8[%c0_11, %c0_12], %12 {strides = array<i32>} : memref<128x64xf32, #tpu.memory_space<vmem>>, vector<128x64xf32>,
    } else {
    }
    %c0 = arith.constant 0 : index
    %c0_1 = arith.constant 0 : index
    %3 = vector.load %arg8[%c0, %c0_1] : memref<128x64xf32, #tpu.memory_space<vmem>>, vector<128x64xf32>
    %c0_2 = arith.constant 0 : index
    %c0_3 = arith.constant 0 : index
    %4 = vector.load %arg3[%c0_2, %c0_3] : memref<128x147xbf16, #tpu.memory_space<vmem>>, vector<128x147xbf16>
    %c0_4 = arith.constant 0 : index
    %c0_5 = arith.constant 0 : index
    %5 = vector.load %arg4[%c0_4, %c0_5] : memref<147x64xbf16, #tpu.memory_space<vmem>>, vector<147x64xbf16>
    %cst = arith.constant dense<0.000000e+00> : vector<128x64xf32>
    %6 = tpu.matmul %4, %5, %cst {dimension_numbers = #tpu.dot_dimension_numbers<[1], [0], [0], [1], [0, 0, 1, 1], [], []>} : vector<128x147xbf16>, vector<147x64xbf16>, vector<128x64xf32> -> vector<128x64xf32>
    %7 = arith.addf %3, %6 : vector<128x64xf32>
    %c0_6 = arith.constant 0 : index
    %c0_7 = arith.constant 0 : index
    %8 = vector.load %arg8[%c0_6, %c0_7] : memref<128x64xf32, #tpu.memory_space<vmem>>, vector<128x64xf32>
    tpu.vector_store %arg8[%c0_6, %c0_7], %7 {strides = array<i32>} : memref<128x64xf32, #tpu.memory_space<vmem>>, vector<128x64xf32>,
    %c0_i32_8 = arith.constant 0 : i32
    %9 = arith.cmpi eq, %arg2, %c0_i32_8 : i32
    %10 = arith.extui %9 : i1 to i32
    %c0_i32_9 = arith.constant 0 : i32
    %11 = arith.cmpi ne, %10, %c0_i32_9 : i32
    scf.if %11 {
      %c0_10 = arith.constant 0 : index
      %c0_11 = arith.constant 0 : index
      %12 = vector.load %arg8[%c0_10, %c0_11] : memref<128x64xf32, #tpu.memory_space<vmem>>, vector<128x64xf32>
      %c0_12 = arith.constant 0 : index
      %c0_13 = arith.constant 0 : index
      %13 = vector.load %arg5[%c0_12, %c0_13] : memref<1x64xf32, #tpu.memory_space<vmem>>, vector<1x64xf32>
      %14 = vector.broadcast %13 : vector<1x64xf32> to vector<128x64xf32>
      %15 = arith.mulf %12, %14 : vector<128x64xf32>
      %c0_14 = arith.constant 0 : index
      %c0_15 = arith.constant 0 : index
      %16 = vector.load %arg6[%c0_14, %c0_15] : memref<1x64xf32, #tpu.memory_space<vmem>>, vector<1x64xf32>
      %17 = vector.broadcast %16 : vector<1x64xf32> to vector<128x64xf32>
      %18 = arith.addf %15, %17 : vector<128x64xf32>
      %cst_16 = arith.constant 0.000000e+00 : f32
      %19 = vector.broadcast %cst_16 : f32 to vector<128x64xf32>
      %20 = arith.maximumf %18, %19 : vector<128x64xf32>
      %21 = arith.truncf %20 : vector<128x64xf32> to vector<128x64xbf16>
      %c0_17 = arith.constant 0 : index
      %c0_18 = arith.constant 0 : index
      %22 = vector.load %arg7[%c0_17, %c0_18] : memref<128x64xbf16, #tpu.memory_space<vmem>>, vector<128x64xbf16>
      tpu.vector_store %arg7[%c0_17, %c0_18], %21 {strides = array<i32>} : memref<128x64xbf16, #tpu.memory_space<vmem>>, vector<128x64xbf16>,
    } else {
    }
    return
  }
  func.func @transform_0(%arg0: i32, %arg1: i32, %arg2: i32) -> (i32, i32) {
    %c0_i32 = arith.constant 0 : i32
    return %arg0, %arg2 : i32, i32
  }
  func.func @transform_1(%arg0: i32, %arg1: i32, %arg2: i32) -> (i32, i32) {
    %c0_i32 = arith.constant 0 : i32
    return %arg2, %arg1 : i32, i32
  }
  func.func @transform_2(%arg0: i32, %arg1: i32, %arg2: i32) -> (i32, i32) {
    %c0_i32 = arith.constant 0 : i32
    %c0_i32_0 = arith.constant 0 : i32
    return %c0_i32, %arg1 : i32, i32
  }
  func.func @transform_3(%arg0: i32, %arg1: i32, %arg2: i32) -> (i32, i32) {
    %c0_i32 = arith.constant 0 : i32
    %c0_i32_0 = arith.constant 0 : i32
    return %c0_i32, %arg1 : i32, i32
  }
  func.func @transform_4(%arg0: i32, %arg1: i32, %arg2: i32) -> (i32, i32) {
    %c0_i32 = arith.constant 0 : i32
    return %arg0, %arg1 : i32, i32
  }
}

</mosaic_0001>

<bundles_post_ra>
// kernel: tpu_custom_call.1
= control target key start
LH: loop header
LB: loop body
LE: loop exit
PB: predicated region body
PF: predicated region fallthrough
CT: control target
= control target key end

     0   :  { %v672_v0 = vmov 0   ;;  %vm22_vm0 = vcmask 523264   ;;  %v673_v3 = vmov 0.0   ;;  %vm219_vm1 = vcmask 154624   ;;  %s944_s1 = inlined_call_operand.vmem [shape: bf16[147,64], index: 1, kind: input, shape index: {}]   ;;  %s945_s0 = inlined_call_operand.vmem [shape: bf16[128,147], index: 0, kind: input, shape index: {}]   ;;  %s946_s2 = inlined_call_operand.vmem [shape: f32[1,64], index: 2, kind: input, shape index: {}]   ;;  %s947_s3 = inlined_call_operand.vmem [shape: f32[1,64], index: 3, kind: input, shape index: {}]   ;;  %s948_s4 = inlined_call_operand.vmem [shape: bf16[128,64], index: 4, kind: output, shape index: {}]  }
   0x1   :  { %251 = vmatprep.subr.bf16.mxu0 %v672_v0  ;;  %615 = vmatprep.subr.bf16.mxu1 %v672_v0  ;;  %v638_v1 = vld [vmem:[%s944_s1] sm:$0xff]   ;;  %v639_v2 = vld [vmem:[%s944_s1 + $0x8] sm:$0xff]   ;;  %23 = vst.msk [vmem:[#allocation2] sm:$0xff] %vm22_vm0, %v673_v3  ;;  %24 = vst.msk [vmem:[#allocation2 + $0x8] sm:$0xff] %vm22_vm0, %v673_v3  ;;  %vm244_vm2 = vcmask 1040384   ;;  %vm245_vm3 = vcmask 1041408  }
   0x2   :  { %252 = vmatpush1.bf16.msra.mxu0 %v638_v1  ;;  %625 = vmatpush1.bf16.msra.mxu1 %v638_v1  ;;  %25 = vst.msk [vmem:[#allocation2 + $0x10] sm:$0xff] %vm22_vm0, %v673_v3  ;;  %26 = vst.msk [vmem:[#allocation2 + $0x18] sm:$0xff] %vm22_vm0, %v673_v3  ;;  %v640_v4 = vld [vmem:[%s944_s1 + $0x10] sm:$0xff]   ;;  %v641_v5 = vld [vmem:[%s944_s1 + $0x18] sm:$0xff]   ;;  %v674_v12 = vmov 65535   ;;  %vm526_vm4 = vcmask 519168  }
   0x3   :  { %253 = vmatprep.subr.bf16.mxu0 %v672_v0  ;;  %616 = vmatprep.subr.bf16.mxu1 %v672_v0  ;;  %27 = vst.msk [vmem:[#allocation2 + $0x20] sm:$0xff] %vm22_vm0, %v673_v3  ;;  %28 = vst.msk [vmem:[#allocation2 + $0x28] sm:$0xff] %vm22_vm0, %v673_v3  ;;  %v650_v6 = vld [vmem:[%s945_s0 + $0x4] ss:$8 sps:$4 sm:$0xff]   ;;  %v644_v10 = vld [vmem:[%s944_s1 + $0x30] sm:$0xff]   ;;  %v246_v13 = vsel %vm244_vm2, 4294967295, %v674_v12 }
   0x4   :  { %29 = vst.msk [vmem:[#allocation2 + $0x30] sm:$0xff] %vm22_vm0, %v673_v3  ;;  %30 = vst.msk [vmem:[#allocation2 + $0x38] sm:$0xff] %vm22_vm0, %v673_v3  ;;  %573 = vmatprep.mubr.msk.bf16.mxu0 %vm219_vm1, %v650_v6  ;;  %v653_v7 = vld [vmem:[%s945_s0 + $0x44] ss:$8 sps:$4 sm:$0xff]   ;;  %v645_v11 = vld [vmem:[%s944_s1 + $0x38] sm:$0xff]   ;;  %v247_v16 = vsel %vm245_vm3, %v246_v13, 0 }
   0x5   :  { %31 = vst.msk [vmem:[#allocation2 + $0x40] sm:$0xff] %vm22_vm0, %v673_v3  ;;  %32 = vst.msk [vmem:[#allocation2 + $0x48] sm:$0xff] %vm22_vm0, %v673_v3  ;;  %v642_v8 = vld [vmem:[%s944_s1 + $0x20] sm:$0xff]   ;;  %577 = vmatprep.mubr.msk.bf16.mxu1 %vm219_vm1, %v653_v7  ;;  %v643_v9 = vld [vmem:[%s944_s1 + $0x28] sm:$0xff]  }
   0x6   :  { %33 = vst.msk [vmem:[#allocation2 + $0x50] sm:$0xff] %vm22_vm0, %v673_v3  ;;  %34 = vst.msk [vmem:[#allocation2 + $0x58] sm:$0xff] %vm22_vm0, %v673_v3  ;;  %254 = vmatpush1.bf16.msra.mxu0 %v639_v2  ;;  %626 = vmatpush1.bf16.msra.mxu1 %v639_v2  ;;  %v646_v14 = vld [vmem:[%s944_s1 + $0x40] sm:$0xff]   ;;  %v647_v15 = vld [vmem:[%s944_s1 + $0x48] ss:$0 sps:$4 sm:$0x33]  }
   0x7   :  { %35 = vst.msk [vmem:[#allocation2 + $0x60] sm:$0xff] %vm22_vm0, %v673_v3  ;;  %36 = vst.msk [vmem:[#allocation2 + $0x68] sm:$0xff] %vm22_vm0, %v673_v3  ;;  %255 = vmatprep.subr.bf16.mxu0 %v672_v0  ;;  %617 = vmatprep.subr.bf16.mxu1 %v672_v0  ;;  %v249_v17 = vand.u32 %v647_v15, %v247_v16  ;;  %v648_v18 = vld [vmem:[%s945_s0] ss:$8 sps:$4 sm:$0xff]   ;;  %v654_v20 = vld [vmem:[%s945_s0 + $0x14] ss:$8 sps:$4 sm:$0xff]  }
   0x8   :  { %37 = vst.msk [vmem:[#allocation2 + $0x70] sm:$0xff] %vm22_vm0, %v673_v3  ;;  %38 = vst.msk [vmem:[#allocation2 + $0x78] sm:$0xff] %vm22_vm0, %v673_v3  ;;  %v651_v19 = vld [vmem:[%s945_s0 + $0x40] ss:$8 sps:$4 sm:$0xff]   ;;  %v656_v21 = vld [vmem:[%s945_s0 + $0x54] ss:$8 sps:$4 sm:$0xff]  }
   0x9   :  { %v658_v22 = vld [vmem:[%s945_s0 + $0x10] ss:$8 sps:$4 sm:$0xff]   ;;  %v660_v24 = vld [vmem:[%s945_s0 + $0x24] ss:$8 sps:$4 sm:$0xff]   ;;  %v664_v26 = vld [vmem:[%s945_s0 + $0x20] ss:$8 sps:$4 sm:$0xff]  }
   0xa   :  { %256 = vmatpush1.bf16.msra.mxu0 %v640_v4  ;;  %627 = vmatpush1.bf16.msra.mxu1 %v640_v4  ;;  %v659_v23 = vld [vmem:[%s945_s0 + $0x50] ss:$8 sps:$4 sm:$0xff]   ;;  %v662_v25 = vld [vmem:[%s945_s0 + $0x64] ss:$8 sps:$4 sm:$0xff]   ;;  %v665_v27 = vld [vmem:[%s945_s0 + $0x60] ss:$8 sps:$4 sm:$0xff]  }
   0xb   :  { %257 = vmatprep.subr.bf16.mxu0 %v672_v0  ;;  %618 = vmatprep.subr.bf16.mxu1 %v672_v0  ;;  %v666_v28 = vld [vmem:[%s945_s0 + $0x34] ss:$8 sps:$4 sm:$0xff]   ;;  %v670_v30 = vld [vmem:[%s945_s0 + $0x30] ss:$8 sps:$4 sm:$0xff]   ;;  %v39_v32 = vld [vmem:[#allocation2] sm:$0xff] }
   0xc   :  { %v668_v29 = vld [vmem:[%s945_s0 + $0x74] ss:$8 sps:$4 sm:$0xff]   ;;  %v671_v31 = vld [vmem:[%s945_s0 + $0x70] ss:$8 sps:$4 sm:$0xff]   ;;  %v47_v33 = vld [vmem:[#allocation2 + $0x40] sm:$0xff] }
   0xd   :  { %v40_v36 = vld [vmem:[#allocation2 + $0x8] sm:$0xff]  ;;  %v41_v48 = vld [vmem:[#allocation2 + $0x10] sm:$0xff]  ;;  %v829_v50 = vld [vmem:[%s946_s2] ss:$0 sm:$0xff] }
   0xe   :  { %258 = vmatpush1.bf16.msra.mxu0 %v641_v5  ;;  %628 = vmatpush1.bf16.msra.mxu1 %v641_v5  ;;  %v48_v37 = vld [vmem:[#allocation2 + $0x48] sm:$0xff]  ;;  %v49_v49 = vld [vmem:[#allocation2 + $0x50] sm:$0xff]  ;;  %v42_v53 = vld [vmem:[#allocation2 + $0x18] sm:$0xff] }
   0xf   :  { %259 = vmatprep.subr.bf16.mxu0 %v672_v0  ;;  %619 = vmatprep.subr.bf16.mxu1 %v672_v0  ;;  %v50_v54 = vld [vmem:[#allocation2 + $0x58] sm:$0xff]  ;;  %v834_v60 = vld [vmem:[%s947_s3] ss:$0 sm:$0xff] }
  0x10   :  { %v43_v16 = vld [vmem:[#allocation2 + $0x20] sm:$0xff] }
  0x12   :  { %260 = vmatpush1.bf16.msra.mxu0 %v642_v8  ;;  %629 = vmatpush1.bf16.msra.mxu1 %v642_v8 }
  0x13   :  { %261 = vmatprep.subr.bf16.mxu0 %v672_v0  ;;  %620 = vmatprep.subr.bf16.mxu1 %v672_v0 }
  0x16   :  { %262 = vmatpush1.bf16.msra.mxu0 %v643_v9  ;;  %630 = vmatpush1.bf16.msra.mxu1 %v643_v9 }
  0x17   :  { %263 = vmatprep.subr.bf16.mxu0 %v672_v0  ;;  %621 = vmatprep.subr.bf16.mxu1 %v672_v0 }
  0x1a   :  { %264 = vmatpush1.bf16.msra.mxu0 %v644_v10  ;;  %631 = vmatpush1.bf16.msra.mxu1 %v644_v10 }
  0x1b   :  { %265 = vmatprep.subr.bf16.mxu0 %v672_v0  ;;  %622 = vmatprep.subr.bf16.mxu1 %v672_v0 }
  0x1e   :  { %266 = vmatpush1.bf16.msra.mxu0 %v645_v11  ;;  %632 = vmatpush1.bf16.msra.mxu1 %v645_v11 }
  0x1f   :  { %267 = vmatprep.subr.bf16.mxu0 %v672_v0  ;;  %623 = vmatprep.subr.bf16.mxu1 %v672_v0 }
  0x22   :  { %268 = vmatpush1.bf16.msra.mxu0 %v646_v14  ;;  %633 = vmatpush1.bf16.msra.mxu1 %v646_v14 }
  0x23   :  { %269 = vmatprep.subr.bf16.mxu0 %v672_v0  ;;  %624 = vmatprep.subr.bf16.mxu1 %v672_v0 }
  0x26   :  { %270 = vmatpush1.bf16.msra.mxu0 %v249_v17  ;;  %634 = vmatpush1.bf16.msra.mxu1 %v249_v17  ;;  %v51_v17 = vld [vmem:[#allocation2 + $0x60] sm:$0xff] }
  0x29   :  { %284 = vmatmul.mubr.bf16.vlgmr.msra.gmra.mrb[0].mxu0 %v648_v18  ;;  %316 = vmatmul.mubr.bf16.vlgmr.msra.gmra.mrb[0].mxu1 %v651_v19 }
  0x2a   :  { %574 = vmatprep.mubr.msk.bf16.mxu0 %vm219_vm1, %v654_v20  ;;  %578 = vmatprep.mubr.msk.bf16.mxu1 %vm219_vm1, %v656_v21 }
  0x31   :  { %292 = vmatmul.mubr.bf16.gmra.mrb[4].mxu0 %v658_v22  ;;  %324 = vmatmul.mubr.bf16.gmra.mrb[4].mxu1 %v659_v23 }
  0x32   :  { %575 = vmatprep.mubr.msk.bf16.mxu0 %vm219_vm1, %v660_v24  ;;  %579 = vmatprep.mubr.msk.bf16.mxu1 %vm219_vm1, %v662_v25 }
  0x39   :  { %300 = vmatmul.mubr.bf16.gmra.mrb[8].mxu0 %v664_v26  ;;  %332 = vmatmul.mubr.bf16.gmra.mrb[8].mxu1 %v665_v27  ;;  %v44_v26 = vld [vmem:[#allocation2 + $0x28] sm:$0xff] }
  0x3a   :  { %576 = vmatprep.mubr.msk.bf16.mxu0 %vm219_vm1, %v666_v28  ;;  %580 = vmatprep.mubr.msk.bf16.mxu1 %vm219_vm1, %v668_v29  ;;  %v52_v27 = vld [vmem:[#allocation2 + $0x68] sm:$0xff] }
  0x41   :  { %308 = vmatmul.mubr.bf16.gmra.mrb[12].mxu0 %v670_v30  ;;  %340 = vmatmul.mubr.bf16.gmra.mrb[12].mxu1 %v671_v31 }
  0xfc   :  { %v285_v34 = vpop.f32.mrb[0].mxu0  ;;  %v317_v35 = vpop.f32.mrb[0].mxu1 }
  0xfd   :  { %v348_v38 = vadd.f32 %v285_v34, %v39_v32  ;;  %v356_v39 = vadd.f32 %v317_v35, %v47_v33  ;;  %v287_v40 = vpop.f32.mrb[1].mxu0  ;;  %v319_v41 = vpop.f32.mrb[1].mxu1 }
  0xfe   :  { %v288_v42 = vpop.f32.mrb[2].mxu0  ;;  %v320_v43 = vpop.f32.mrb[2].mxu1 }
  0xff   :  { %365 = vst.msk [vmem:[#allocation2] sm:$0xff] %vm22_vm0, %v348_v38  ;;  %373 = vst.msk [vmem:[#allocation2 + $0x40] sm:$0xff] %vm22_vm0, %v356_v39  ;;  %v349_v44 = vadd.f32 %v288_v42, %v40_v36  ;;  %v357_v45 = vadd.f32 %v320_v43, %v48_v37  ;;  %v290_v46 = vpop.f32.mrb[3].mxu0  ;;  %v322_v47 = vpop.f32.mrb[3].mxu1 }
 0x101   :  { %366 = vst.msk [vmem:[#allocation2 + $0x8] sm:$0xff] %vm22_vm0, %v349_v44  ;;  %374 = vst.msk [vmem:[#allocation2 + $0x48] sm:$0xff] %vm22_vm0, %v357_v45 }
 0x104   :  { %v293_v51 = vpop.f32.mrb[4].mxu0  ;;  %v325_v52 = vpop.f32.mrb[4].mxu1 }
 0x105   :  { %v350_v55 = vadd.f32 %v293_v51, %v41_v48  ;;  %v358_v56 = vadd.f32 %v325_v52, %v49_v49  ;;  %v295_v57 = vpop.f32.mrb[5].mxu0  ;;  %v327_v58 = vpop.f32.mrb[5].mxu1 }
 0x106   :  { %v384_v59 = vld [vmem:[#allocation2] sm:$0xff]  ;;  %v296_v62 = vpop.f32.mrb[6].mxu0  ;;  %v328_v63 = vpop.f32.mrb[6].mxu1  ;;  %v46_v57 = vld [vmem:[#allocation2 + $0x38] sm:$0xff] }
 0x107   :  { %v392_v61 = vld [vmem:[#allocation2 + $0x40] sm:$0xff]  ;;  %v407_v0 = vmul.f32 %v829_v50, %v384_v59  ;;  %367 = vst.msk [vmem:[#allocation2 + $0x10] sm:$0xff] %vm22_vm0, %v350_v55  ;;  %375 = vst.msk [vmem:[#allocation2 + $0x50] sm:$0xff] %vm22_vm0, %v358_v56  ;;  %v351_v2 = vadd.f32 %v296_v62, %v42_v53  ;;  %v359_v3 = vadd.f32 %v328_v63, %v50_v54  ;;  %v298_v4 = vpop.f32.mrb[7].mxu0  ;;  %v330_v5 = vpop.f32.mrb[7].mxu1  ;;  %v45_v53 = vld [vmem:[#allocation2 + $0x30] sm:$0xff] }
 0x108   :  { %v415_v1 = vmul.f32 %v829_v50, %v392_v61  ;;  %v385_v6 = vld [vmem:[#allocation2 + $0x8] sm:$0xff]  ;;  %v53_v54 = vld [vmem:[#allocation2 + $0x70] sm:$0xff]  ;;  %v54_v58 = vld [vmem:[#allocation2 + $0x78] sm:$0xff] }
 0x109   :  { %v393_v7 = vld [vmem:[#allocation2 + $0x48] sm:$0xff]  ;;  %v430_v8 = vadd.f32 %v834_v60, %v407_v0  ;;  %v408_v10 = vmul.f32 %v829_v50, %v385_v6  ;;  %368 = vst.msk [vmem:[#allocation2 + $0x18] sm:$0xff] %vm22_vm0, %v351_v2  ;;  %376 = vst.msk [vmem:[#allocation2 + $0x58] sm:$0xff] %vm22_vm0, %v359_v3 }
 0x10a   :  { %v438_v9 = vadd.f32 %v834_v60, %v415_v1  ;;  %v416_v11 = vmul.f32 %v829_v50, %v393_v7 }
 0x10b   :  { %v446_v12 = vmax.f32 %v430_v8, 0.0  ;;  %v431_v14 = vadd.f32 %v834_v60, %v408_v10 }
 0x10c   :  { %v454_v13 = vmax.f32 %v438_v9, 0.0  ;;  %v439_v15 = vadd.f32 %v834_v60, %v416_v11  ;;  %v301_v18 = vpop.f32.mrb[8].mxu0  ;;  %v333_v19 = vpop.f32.mrb[8].mxu1 }
 0x10d   :  { %v599_v20 = vpack.c.bf16 %v446_v12, %v446_v12  ;;  %v447_v22 = vmax.f32 %v431_v14, 0.0  ;;  %v303_v24 = vpop.f32.mrb[9].mxu0  ;;  %v335_v25 = vpop.f32.mrb[9].mxu1  ;;  %v352_v30 = vadd.f32 %v301_v18, %v43_v16  ;;  %v360_v31 = vadd.f32 %v333_v19, %v51_v17 }
 0x10e   :  { %v607_v21 = vpack.c.bf16 %v454_v13, %v454_v13  ;;  %v455_v23 = vmax.f32 %v439_v15, 0.0  ;;  %v386_v28 = vld [vmem:[#allocation2 + $0x10] sm:$0xff]  ;;  %v304_v32 = vpop.f32.mrb[10].mxu0  ;;  %v336_v33 = vpop.f32.mrb[10].mxu1 }
 0x10f   :  { %v394_v29 = vld [vmem:[#allocation2 + $0x50] sm:$0xff]  ;;  %527 = vst.msk [vmem:[%s948_s4] sm:$0xf] %vm526_vm4, %v599_v20  ;;  %v600_v34 = vpack.c.bf16 %v447_v22, %v447_v22  ;;  %v409_v36 = vmul.f32 %v829_v50, %v386_v28  ;;  %v306_v38 = vpop.f32.mrb[11].mxu0  ;;  %v338_v39 = vpop.f32.mrb[11].mxu1  ;;  %v353_v42 = vadd.f32 %v304_v32, %v44_v26  ;;  %v361_v43 = vadd.f32 %v336_v33, %v52_v27 }
 0x110   :  { %535 = vst.msk [vmem:[%s948_s4 + $0x20] sm:$0xf] %vm526_vm4, %v607_v21  ;;  %v608_v35 = vpack.c.bf16 %v455_v23, %v455_v23  ;;  %v417_v37 = vmul.f32 %v829_v50, %v394_v29  ;;  %v387_v40 = vld [vmem:[#allocation2 + $0x18] sm:$0xff] }
 0x111   :  { %v395_v41 = vld [vmem:[#allocation2 + $0x58] sm:$0xff]  ;;  %369 = vst.msk [vmem:[#allocation2 + $0x20] sm:$0xff] %vm22_vm0, %v352_v30  ;;  %377 = vst.msk [vmem:[#allocation2 + $0x60] sm:$0xff] %vm22_vm0, %v360_v31  ;;  %v432_v44 = vadd.f32 %v834_v60, %v409_v36  ;;  %v410_v46 = vmul.f32 %v829_v50, %v387_v40 }
 0x112   :  { %528 = vst.msk [vmem:[%s948_s4 + $0x4] sm:$0xf] %vm526_vm4, %v600_v34  ;;  %536 = vst.msk [vmem:[%s948_s4 + $0x24] sm:$0xf] %vm526_vm4, %v608_v35  ;;  %v440_v45 = vadd.f32 %v834_v60, %v417_v37  ;;  %v418_v47 = vmul.f32 %v829_v50, %v395_v41 }
 0x113   :  { %370 = vst.msk [vmem:[#allocation2 + $0x28] sm:$0xff] %vm22_vm0, %v353_v42  ;;  %378 = vst.msk [vmem:[#allocation2 + $0x68] sm:$0xff] %vm22_vm0, %v361_v43  ;;  %v448_v48 = vmax.f32 %v432_v44, 0.0  ;;  %v433_v51 = vadd.f32 %v834_v60, %v410_v46 }
 0x114   :  { %v456_v49 = vmax.f32 %v440_v45, 0.0  ;;  %v441_v52 = vadd.f32 %v834_v60, %v418_v47  ;;  %v309_v55 = vpop.f32.mrb[12].mxu0  ;;  %v341_v56 = vpop.f32.mrb[12].mxu1 }
 0x115   :  { %v601_v59 = vpack.c.bf16 %v448_v48, %v448_v48  ;;  %v449_v62 = vmax.f32 %v433_v51, 0.0  ;;  %v311_v0 = vpop.f32.mrb[13].mxu0  ;;  %v343_v1 = vpop.f32.mrb[13].mxu1  ;;  %v354_v2 = vadd.f32 %v309_v55, %v45_v53  ;;  %v362_v3 = vadd.f32 %v341_v56, %v53_v54 }
 0x116   :  { %v609_v61 = vpack.c.bf16 %v456_v49, %v456_v49  ;;  %v457_v63 = vmax.f32 %v441_v52, 0.0  ;;  %v312_v4 = vpop.f32.mrb[14].mxu0  ;;  %v344_v5 = vpop.f32.mrb[14].mxu1 }
 0x117   :  { %529 = vst.msk [vmem:[%s948_s4 + $0x8] sm:$0xf] %vm526_vm4, %v601_v59  ;;  %v602_v6 = vpack.c.bf16 %v449_v62, %v449_v62  ;;  %v355_v10 = vadd.f32 %v312_v4, %v46_v57  ;;  %v363_v11 = vadd.f32 %v344_v5, %v54_v58  ;;  %v314_v12 = vpop.f32.mrb[15].mxu0  ;;  %v346_v13 = vpop.f32.mrb[15].mxu1 }
 0x118   :  { %537 = vst.msk [vmem:[%s948_s4 + $0x28] sm:$0xf] %vm526_vm4, %v609_v61  ;;  %v610_v7 = vpack.c.bf16 %v457_v63, %v457_v63  ;;  %v388_v8 = vld [vmem:[#allocation2 + $0x20] sm:$0xff] }
 0x119   :  { %v396_v9 = vld [vmem:[#allocation2 + $0x60] sm:$0xff]  ;;  %v411_v14 = vmul.f32 %v829_v50, %v388_v8  ;;  %371 = vst.msk [vmem:[#allocation2 + $0x30] sm:$0xff] %vm22_vm0, %v354_v2  ;;  %379 = vst.msk [vmem:[#allocation2 + $0x70] sm:$0xff] %vm22_vm0, %v362_v3 }
 0x11a   :  { %v419_v15 = vmul.f32 %v829_v50, %v396_v9  ;;  %530 = vst.msk [vmem:[%s948_s4 + $0xc] sm:$0xf] %vm526_vm4, %v602_v6  ;;  %538 = vst.msk [vmem:[%s948_s4 + $0x2c] sm:$0xf] %vm526_vm4, %v610_v7  ;;  %v389_v16 = vld [vmem:[#allocation2 + $0x28] sm:$0xff] }
 0x11b   :  { %v397_v17 = vld [vmem:[#allocation2 + $0x68] sm:$0xff]  ;;  %372 = vst.msk [vmem:[#allocation2 + $0x38] sm:$0xff] %vm22_vm0, %v355_v10  ;;  %380 = vst.msk [vmem:[#allocation2 + $0x78] sm:$0xff] %vm22_vm0, %v363_v11  ;;  %v434_v18 = vadd.f32 %v834_v60, %v411_v14  ;;  %v412_v20 = vmul.f32 %v829_v50, %v389_v16 }
 0x11c   :  { %v442_v19 = vadd.f32 %v834_v60, %v419_v15  ;;  %v420_v21 = vmul.f32 %v829_v50, %v397_v17 }
 0x11d   :  { %v450_v22 = vmax.f32 %v434_v18, 0.0  ;;  %v435_v24 = vadd.f32 %v834_v60, %v412_v20 }
 0x11e   :  { %v458_v23 = vmax.f32 %v442_v19, 0.0  ;;  %v443_v25 = vadd.f32 %v834_v60, %v420_v21 }
 0x11f   :  { %v603_v26 = vpack.c.bf16 %v450_v22, %v450_v22  ;;  %v451_v28 = vmax.f32 %v435_v24, 0.0 }
 0x120   :  { %v611_v27 = vpack.c.bf16 %v458_v23, %v458_v23  ;;  %v459_v29 = vmax.f32 %v443_v25, 0.0  ;;  %v390_v30 = vld [vmem:[#allocation2 + $0x30] sm:$0xff] }
 0x121   :  { %v398_v31 = vld [vmem:[#allocation2 + $0x70] sm:$0xff]  ;;  %531 = vst.msk [vmem:[%s948_s4 + $0x10] sm:$0xf] %vm526_vm4, %v603_v26  ;;  %v604_v32 = vpack.c.bf16 %v451_v28, %v451_v28  ;;  %v413_v34 = vmul.f32 %v829_v50, %v390_v30 }
 0x122   :  { %539 = vst.msk [vmem:[%s948_s4 + $0x30] sm:$0xf] %vm526_vm4, %v611_v27  ;;  %v612_v33 = vpack.c.bf16 %v459_v29, %v459_v29  ;;  %v421_v35 = vmul.f32 %v829_v50, %v398_v31  ;;  %v391_v36 = vld [vmem:[#allocation2 + $0x38] sm:$0xff] }
 0x123   :  { %v399_v37 = vld [vmem:[#allocation2 + $0x78] sm:$0xff]  ;;  %v414_v38 = vmul.f32 %v829_v50, %v391_v36  ;;  %532 = vst.msk [vmem:[%s948_s4 + $0x14] sm:$0xf] %vm526_vm4, %v604_v32  ;;  %v436_v40 = vadd.f32 %v834_v60, %v413_v34 }
 0x124   :  { %v422_v39 = vmul.f32 %v829_v50, %v399_v37  ;;  %540 = vst.msk [vmem:[%s948_s4 + $0x34] sm:$0xf] %vm526_vm4, %v612_v33  ;;  %v444_v41 = vadd.f32 %v834_v60, %v421_v35 }
 0x125   :  { %v437_v42 = vadd.f32 %v834_v60, %v414_v38  ;;  %v452_v44 = vmax.f32 %v436_v40, 0.0 }
 0x126   :  { %v445_v43 = vadd.f32 %v834_v60, %v422_v39  ;;  %v460_v50 = vmax.f32 %v444_v41, 0.0 }
 0x127   :  { %v453_v45 = vmax.f32 %v437_v42, 0.0  ;;  %v605_v47 = vpack.c.bf16 %v452_v44, %v452_v44 }
 0x128   :  { %v461_v46 = vmax.f32 %v445_v43, 0.0  ;;  %v613_v48 = vpack.c.bf16 %v460_v50, %v460_v50 }
 0x129   :  { %v606_v49 = vpack.c.bf16 %v453_v45, %v453_v45  ;;  %533 = vst.msk [vmem:[%s948_s4 + $0x18] sm:$0xf] %vm526_vm4, %v605_v47 }
 0x12a   :  { %v614_v51 = vpack.c.bf16 %v461_v46, %v461_v46  ;;  %541 = vst.msk [vmem:[%s948_s4 + $0x38] sm:$0xf] %vm526_vm4, %v613_v48 }
 0x12b   :  { %534 = vst.msk [vmem:[%s948_s4 + $0x1c] sm:$0xf] %vm526_vm4, %v606_v49 }
 0x12c   :  { %542 = vst.msk [vmem:[%s948_s4 + $0x3c] sm:$0xf] %vm526_vm4, %v614_v51 }

</bundles_post_ra>
